<compile_context>
chip_gen: v7x
topology: tpu7x:2x2x1
jax: 0.10.0
libtpu: 0.0.40
codegen_flags: <defaults>
</compile_context>

<pallas_src>
import jax
import jax.numpy as jnp
from jax.experimental import pallas as pl
from jax.experimental.pallas import tpu as pltpu

LANE = 128


def _round_up(x, m):
    return (x + m - 1) // m * m


def normalnet_kernel(se_ref, ids_ref, ew_ref, b_ref, out_ref, acc_ref):
    """One (bag-tile, V-tile) step of the folded NormalNet forward.

    se_ref : [TB, 2]  int32    per-bag (start, end) token offsets
    ids_ref: [T, 1]   int32    flat token ids ("text")
    ew_ref : [TV, Cp] bf16     V-tile of folded table EW = emb @ W^T (padded)
    b_ref  : [1, Cp]  f32      fc bias (padded)
    out_ref: [TB, Cp] f32      logits
    acc_ref: [TB, Cp] f32      VMEM accumulator over the V grid axis
    """
    k = pl.program_id(1)

    @pl.when(k == 0)
    def _():
        acc_ref[...] = jnp.zeros_like(acc_ref)

    ids = ids_ref[...]                                        # [T, 1] int32
    T = ids.shape[0]
    TB = se_ref.shape[0]
    TV = ew_ref.shape[0]

    se = se_ref[...]                                          # [TB, 2]
    starts = se[:, 0:1]                                       # [TB, 1]
    ends = se[:, 1:2]                                         # [TB, 1]

    # Membership built on the VPU (token t in bag b iff s_b <= t < e_b).
    tok = jax.lax.broadcasted_iota(jnp.int32, (TB, T), 1)     # [TB, T]
    member = ((tok >= starts) & (tok < ends)).astype(jnp.bfloat16)  # exact 0/1

    # One-hot for THIS V-tile only (exact 0/1 bf16). Out-of-range ids -> zero
    # row (behavioral divergence from torch, which raises on OOB indices).
    v0 = k * TV
    col = jax.lax.broadcasted_iota(jnp.int32, (T, TV), 1) + v0  # [T, TV]
    onehot = (col == ids).astype(jnp.bfloat16)                  # [T, TV]

    # Cheap first contraction -> exact per-bag token counts for this V-tile
    # (small integers, exact in bf16 up to 256 tokens/bag).
    bag_tok = jnp.dot(member, onehot,
                      preferred_element_type=jnp.float32)       # [TB, TV]

    # Dominant MXU contraction in bf16 with f32 accumulation.
    acc_ref[...] += jnp.dot(bag_tok.astype(jnp.bfloat16), ew_ref[...],
                            preferred_element_type=jnp.float32)  # [TB, Cp]

    @pl.when(k == pl.num_programs(1) - 1)
    def _():
        # Mean + bias applied once to the final accumulator (EUP reciprocal).
        counts = (ends - starts).astype(jnp.float32)             # [TB, 1]
        inv = pl.reciprocal(jnp.maximum(counts, 1.0), approx=True)
        out_ref[...] = acc_ref[...] * inv + b_ref[...]


def prepare_params(emb_table, fc_w, fc_b):
    """One-time parameter prep (fold Linear into table, pad, cast). Hoisted out
    of the per-call forward per perf review."""
    V, _ = emb_table.shape
    C = fc_w.shape[0]
    Vp = _round_up(V, LANE)
    Cp = _round_up(C, LANE)

    ew = jnp.dot(emb_table, fc_w.T)                               # [V, C] f32 fold
    ew_p = jnp.pad(ew, ((0, Vp - V), (0, Cp - C))).astype(jnp.bfloat16)
    b_p = jnp.pad(fc_b, (0, Cp - C)).astype(jnp.float32)[None, :]  # [1, Cp]
    return ew_p, b_p, C


def normalnet_forward(text, offsets, ew_p, b_p, num_class):
    """NormalNet.forward(text, offsets) with pre-folded params.

    text    : [T] int32 flat token ids
    offsets : [B] int32 bag start offsets (assumed sorted ascending, torch
              EmbeddingBag style; empty bags produce the bias vector)
    ew_p    : [Vp, Cp] bf16 folded table (from prepare_params)
    b_p     : [1, Cp]  f32 bias (from prepare_params)
    returns : [B, num_class] f32
    """
    T = text.shape[0]
    B = offsets.shape[0]
    Vp, Cp = ew_p.shape

    # Bag tile: up to 256 rows to fill the MXU; pad B to a multiple of TB
    # (padded bags are empty -> produce bias, sliced off below).
    TB = min(256, _round_up(B, 8))
    Bp = _round_up(B, TB)
    # V tile: biggest of 512/256/128 that divides Vp (always succeeds at 128).
    TV = next(t for t in (512, 256, 128) if Vp % t == 0)

    starts = offsets.astype(jnp.int32)
    ends = jnp.concatenate([starts[1:], jnp.array([T], jnp.int32)])
    se = jnp.stack([starts, ends], axis=1)                        # [B, 2]
    se = jnp.pad(se, ((0, Bp - B), (0, 0)))                       # [Bp, 2]
    ids2d = text.astype(jnp.int32)[:, None]                       # [T, 1]

    grid = (Bp // TB, Vp // TV)

    out_p = pl.pallas_call(
        normalnet_kernel,
        out_shape=jax.ShapeDtypeStruct((Bp, Cp), jnp.float32),
        grid_spec=pltpu.PrefetchScalarGridSpec(
            num_scalar_prefetch=0,
            grid=grid,
            in_specs=[
                pl.BlockSpec((TB, 2), lambda i, k: (i, 0)),    # bag (start, end)
                pl.BlockSpec((T, 1), lambda i, k: (0, 0)),     # token ids
                pl.BlockSpec((TV, Cp), lambda i, k: (k, 0)),   # folded table tile
                pl.BlockSpec((1, Cp), lambda i, k: (0, 0)),    # bias
            ],
            out_specs=pl.BlockSpec((TB, Cp), lambda i, k: (i, 0)),
            scratch_shapes=[pltpu.VMEM((TB, Cp), jnp.float32)],
        ),
        compiler_params=pltpu.CompilerParams(
            dimension_semantics=("parallel", "arbitrary")),
    )(se, ids2d, ew_p, b_p)

    return out_p[:B, :num_class]


def reference_forward(text, offsets, emb_table, fc_w, fc_b):
    """Pure-JAX f32 reference (semantics of EmbeddingBag(mean) + Linear)."""
    T = text.shape[0]
    starts = offsets.astype(jnp.int32)
    ends = jnp.concatenate([starts[1:], jnp.array([T], jnp.int32)])
    gathered = emb_table[text]                                          # [T, D]
    tok = jnp.arange(T, dtype=jnp.int32)[None, :]
    member = ((tok >= starts[:, None]) & (tok < ends[:, None])).astype(jnp.float32)
    counts = jnp.maximum(member.sum(axis=1, keepdims=True), 1.0)
    pooled = (member @ gathered) / counts                               # [B, D]
    return pooled @ fc_w.T + fc_b[None, :]


if __name__ == "__main__":
    # Small, deterministic setup consistent with the module.
    vocab_size = 50
    embed_dim = 64
    num_class = 4
    batch = 8          # number of bags (offsets length)
    tokens_total = 32  # flat text length

    key = jax.random.PRNGKey(0)
    k_emb, k_fc, k_txt = jax.random.split(key, 3)

    initrange = 0.5
    emb_table = jax.random.uniform(
        k_emb, (vocab_size, embed_dim), jnp.float32, -initrange, initrange)
    fc_w = jax.random.uniform(
        k_fc, (num_class, embed_dim), jnp.float32, -initrange, initrange)
    fc_b = jnp.zeros((num_class,), jnp.float32)

    text = jax.random.randint(k_txt, (tokens_total,), 0, vocab_size, jnp.int32)
    # 8 bags of 4 tokens each -> offsets [0, 4, 8, ..., 28]
    offsets = jnp.arange(0, tokens_total, tokens_total // batch, dtype=jnp.int32)

    # One-time parameter prep (fold + pad + bf16 cast), hoisted out of forward.
    ew_p, b_p, C = prepare_params(emb_table, fc_w, fc_b)
    ew_p, b_p = jax.block_until_ready((ew_p, b_p))

    out = normalnet_forward(text, offsets, ew_p, b_p, C)
    out = jax.block_until_ready(out)

    ref = reference_forward(text, offsets, emb_table, fc_w, fc_b)
    assert out.shape == (batch, num_class)
    # bf16 folded table + approx reciprocal => relaxed tolerance vs f32 reference.
    assert jnp.allclose(out, ref, atol=2e-2, rtol=2e-2), "mismatch vs reference"

    print("KERNEL_OK")
</pallas_src>

<mosaic_0001>
module attributes {stable_mosaic.version = 11 : i64} {
  func.func @normalnet_kernel(%arg0: i32, %arg1: i32, %arg2: memref<8x2xi32, #tpu.memory_space<vmem>>, %arg3: memref<32x1xi32, #tpu.memory_space<vmem>>, %arg4: memref<128x128xbf16, #tpu.memory_space<vmem>>, %arg5: memref<1x128xf32, #tpu.memory_space<vmem>>, %arg6: memref<8x128xf32, #tpu.memory_space<vmem>>, %arg7: memref<8x128xf32, #tpu.memory_space<vmem>>) attributes {dimension_semantics = [#tpu.dimension_semantics<parallel>, #tpu.dimension_semantics<arbitrary>], iteration_bounds = array<i64: 1, 1>, scalar_prefetch = 0 : i64, scratch_operands = 1 : i64, tpu.core_type = #tpu.core_type<tc>, window_params = [{transform_indices = @transform_0, window_bounds = array<i64: 8, 2>}, {pipeline_mode = #tpu.pipeline_mode<synchronous>, transform_indices = @transform_1, window_bounds = array<i64: 32, 1>}, {transform_indices = @transform_2, window_bounds = array<i64: 128, 128>}, {pipeline_mode = #tpu.pipeline_mode<synchronous>, transform_indices = @transform_3, window_bounds = array<i64: 1, 128>}, {transform_indices = @transform_4, window_bounds = array<i64: 8, 128>}]} {
    %c0_i32 = arith.constant 0 : i32
    %0 = arith.cmpi eq, %arg1, %c0_i32 : i32
    %1 = arith.extui %0 : i1 to i32
    %c0_i32_0 = arith.constant 0 : i32
    %2 = arith.cmpi ne, %1, %c0_i32_0 : i32
    scf.if %2 {
      %cst_13 = arith.constant 0.000000e+00 : f32
      %35 = vector.broadcast %cst_13 : f32 to vector<8x128xf32>
      %c0_14 = arith.constant 0 : index
      %c0_15 = arith.constant 0 : index
      %36 = vector.load %arg7[%c0_14, %c0_15] : memref<8x128xf32, #tpu.memory_space<vmem>>, vector<8x128xf32>
      tpu.vector_store %arg7[%c0_14, %c0_15], %35 {strides = array<i32>} : memref<8x128xf32, #tpu.memory_space<vmem>>, vector<8x128xf32>,
    } else {
    }
    %c0 = arith.constant 0 : index
    %c0_1 = arith.constant 0 : index
    %3 = vector.load %arg3[%c0, %c0_1] : memref<32x1xi32, #tpu.memory_space<vmem>>, vector<32x1xi32>
    %c0_2 = arith.constant 0 : index
    %c0_3 = arith.constant 0 : index
    %4 = vector.load %arg2[%c0_2, %c0_3] : memref<8x2xi32, #tpu.memory_space<vmem>>, vector<8x2xi32>
    %5 = vector.extract_strided_slice %4 {offsets = [0, 0], sizes = [8, 1], strides = [1, 1]} : vector<8x2xi32> to vector<8x1xi32>
    %6 = vector.extract_strided_slice %4 {offsets = [0, 1], sizes = [8, 1], strides = [1, 1]} : vector<8x2xi32> to vector<8x1xi32>
    %7 = tpu.iota {dimensions = array<i32: 1>} : vector<8x32xi32>
    %8 = vector.broadcast %5 : vector<8x1xi32> to vector<8x32xi32>
    %9 = arith.cmpi sge, %7, %8 : vector<8x32xi32>
    %10 = vector.broadcast %6 : vector<8x1xi32> to vector<8x32xi32>
    %11 = arith.cmpi slt, %7, %10 : vector<8x32xi32>
    %12 = arith.andi %9, %11 : vector<8x32xi1>
    %13 = arith.extui %12 : vector<8x32xi1> to vector<8x32xi32>
    %14 = arith.sitofp %13 : vector<8x32xi32> to vector<8x32xf32>
    %15 = arith.truncf %14 : vector<8x32xf32> to vector<8x32xbf16>
    %c128_i32 = arith.constant 128 : i32
    %16 = arith.muli %arg1, %c128_i32 : i32
    %17 = tpu.iota {dimensions = array<i32: 1>} : vector<32x128xi32>
    %18 = vector.broadcast %16 : i32 to vector<32x128xi32>
    %19 = arith.addi %17, %18 : vector<32x128xi32>
    %20 = vector.broadcast %3 : vector<32x1xi32> to vector<32x128xi32>
    %21 = arith.cmpi eq, %19, %20 : vector<32x128xi32>
    %22 = arith.extui %21 : vector<32x128xi1> to vector<32x128xi32>
    %23 = arith.sitofp %22 : vector<32x128xi32> to vector<32x128xf32>
    %24 = arith.truncf %23 : vector<32x128xf32> to vector<32x128xbf16>
    %cst = arith.constant dense<0.000000e+00> : vector<8x128xf32>
    %25 = tpu.matmul %15, %24, %cst {dimension_numbers = #tpu.dot_dimension_numbers<[1], [0], [0], [1], [0, 0, 1, 1], [], []>} : vector<8x32xbf16>, vector<32x128xbf16>, vector<8x128xf32> -> vector<8x128xf32>
    %c0_4 = arith.constant 0 : index
    %c0_5 = arith.constant 0 : index
    %26 = vector.load %arg7[%c0_4, %c0_5] : memref<8x128xf32, #tpu.memory_space<vmem>>, vector<8x128xf32>
    %27 = arith.truncf %25 : vector<8x128xf32> to vector<8x128xbf16>
    %c0_6 = arith.constant 0 : index
    %c0_7 = arith.constant 0 : index
    %28 = vector.load %arg4[%c0_6, %c0_7] : memref<128x128xbf16, #tpu.memory_space<vmem>>, vector<128x128xbf16>
    %cst_8 = arith.constant dense<0.000000e+00> : vector<8x128xf32>
    %29 = tpu.matmul %27, %28, %cst_8 {dimension_numbers = #tpu.dot_dimension_numbers<[1], [0], [0], [1], [0, 0, 1, 1], [], []>} : vector<8x128xbf16>, vector<128x128xbf16>, vector<8x128xf32> -> vector<8x128xf32>
    %30 = arith.addf %26, %29 : vector<8x128xf32>
    %c0_9 = arith.constant 0 : index
    %c0_10 = arith.constant 0 : index
    %31 = vector.load %arg7[%c0_9, %c0_10] : memref<8x128xf32, #tpu.memory_space<vmem>>, vector<8x128xf32>
    tpu.vector_store %arg7[%c0_9, %c0_10], %30 {strides = array<i32>} : memref<8x128xf32, #tpu.memory_space<vmem>>, vector<8x128xf32>,
    %c0_i32_11 = arith.constant 0 : i32
    %32 = arith.cmpi eq, %arg1, %c0_i32_11 : i32
    %33 = arith.extui %32 : i1 to i32
    %c0_i32_12 = arith.constant 0 : i32
    %34 = arith.cmpi ne, %33, %c0_i32_12 : i32
    scf.if %34 {
      %35 = arith.subi %6, %5 : vector<8x1xi32>
      %36 = arith.sitofp %35 : vector<8x1xi32> to vector<8x1xf32>
      %cst_13 = arith.constant 1.000000e+00 : f32
      %37 = vector.broadcast %cst_13 : f32 to vector<8x1xf32>
      %38 = arith.maximumf %36, %37 : vector<8x1xf32>
      %39 = tpu.reciprocal %38 {approx = true} : vector<8x1xf32> -> vector<8x1xf32>
      %c0_14 = arith.constant 0 : index
      %c0_15 = arith.constant 0 : index
      %40 = vector.load %arg7[%c0_14, %c0_15] : memref<8x128xf32, #tpu.memory_space<vmem>>, vector<8x128xf32>
      %41 = vector.broadcast %39 : vector<8x1xf32> to vector<8x128xf32>
      %42 = arith.mulf %40, %41 : vector<8x128xf32>
      %c0_16 = arith.constant 0 : index
      %c0_17 = arith.constant 0 : index
      %43 = vector.load %arg5[%c0_16, %c0_17] : memref<1x128xf32, #tpu.memory_space<vmem>>, vector<1x128xf32>
      %44 = vector.broadcast %43 : vector<1x128xf32> to vector<8x128xf32>
      %45 = arith.addf %42, %44 : vector<8x128xf32>
      %c0_18 = arith.constant 0 : index
      %c0_19 = arith.constant 0 : index
      %46 = vector.load %arg6[%c0_18, %c0_19] : memref<8x128xf32, #tpu.memory_space<vmem>>, vector<8x128xf32>
      tpu.vector_store %arg6[%c0_18, %c0_19], %45 {strides = array<i32>} : memref<8x128xf32, #tpu.memory_space<vmem>>, vector<8x128xf32>,
    } else {
    }
    return
  }
  func.func @transform_0(%arg0: i32, %arg1: i32) -> (i32, i32) {
    %c0_i32 = arith.constant 0 : i32
    %c0_i32_0 = arith.constant 0 : i32
    return %arg0, %c0_i32 : i32, i32
  }
  func.func @transform_1(%arg0: i32, %arg1: i32) -> (i32, i32) {
    %c0_i32 = arith.constant 0 : i32
    %c0_i32_0 = arith.constant 0 : i32
    %c0_i32_1 = arith.constant 0 : i32
    return %c0_i32, %c0_i32_0 : i32, i32
  }
  func.func @transform_2(%arg0: i32, %arg1: i32) -> (i32, i32) {
    %c0_i32 = arith.constant 0 : i32
    %c0_i32_0 = arith.constant 0 : i32
    return %arg1, %c0_i32 : i32, i32
  }
  func.func @transform_3(%arg0: i32, %arg1: i32) -> (i32, i32) {
    %c0_i32 = arith.constant 0 : i32
    %c0_i32_0 = arith.constant 0 : i32
    %c0_i32_1 = arith.constant 0 : i32
    return %c0_i32, %c0_i32_0 : i32, i32
  }
  func.func @transform_4(%arg0: i32, %arg1: i32) -> (i32, i32) {
    %c0_i32 = arith.constant 0 : i32
    %c0_i32_0 = arith.constant 0 : i32
    return %arg0, %c0_i32 : i32, i32
  }
}

</mosaic_0001>

<bundles_post_ra>
// kernel: tpu_custom_call.1
= control target key start
LH: loop header
LB: loop body
LE: loop exit
PB: predicated region body
PF: predicated region fallthrough
CT: control target
= control target key end

     0   :  { %9 = vsyncpa [#allocation4], 0  ;;  %s494_s0 = inlined_call_operand.vmem [shape: s32[8,2], index: 0, kind: input, shape index: {}]   ;;  %s495_s1 = inlined_call_operand.vmem [shape: s32[32,1], index: 1, kind: input, shape index: {}]   ;;  %s496_s2 = inlined_call_operand.hbm [shape: bf16[128,128], index: 2, kind: input, shape index: {}]   ;;  %s497_s3 = inlined_call_operand.vmem [shape: f32[1,128], index: 3, kind: input, shape index: {}]   ;;  %s498_s4 = inlined_call_operand.hbm [shape: f32[8,128], index: 4, kind: output, shape index: {}]  }
   0x1   :  { %10 = vsyncpa [#allocation5], 0  ;;  %s411_s15 = smov [#allocation3]   ;;  %s363_s19 = scalar_lea.hbm %s496_s2, 1024 }
   0x2   :  { %s20_s16 = sshll.u32 %s411_s15, 4  ;;  %p364_p0 = scmp.ne.s32.totalorder %s496_s2, %s363_s19  ;;  %s21_s16 = int_to_ptr.vmem [resolvable:$true] %s20_s16 }
   0x3   :  { %p367_p1 = scmp.lt.u32.totalorder %s363_s19, %s496_s2 }
   0x5   :  { %p369_p2 = pnand %p367_p1, %p364_p0 }
   0x7   :  { %372 = shalt.err (!%p369_p2)
}
   0x8   :  { %s373_s24 = scalar_lea.vmem %s21_s16, 1024  ;;  %p378_p4 = scmp.lt.s32.totalorder %s21_s16, %s21_s16 }
   0x9   :  { %p374_p3 = scmp.ne.s32.totalorder %s21_s16, %s373_s24  ;;  %p379_p5 = scmp.lt.s32.totalorder %s373_s24, %s373_s24 }
   0xb   :  { %p380_p6 = por %p379_p5, %p378_p4 }
   0xd   :  { %p381_p7 = pnand %p380_p6, %p374_p3 }
   0xf   :  { %384 = shalt.err (!%p381_p7)
}
  0x10   :  { %s412_s25 = smov 64   ;;  %s413_s26 = smov 4  }
  0x11   :  { %26 = dma.hbm_to_vmem [thread:$0]  %s496_s2, 1024, %s21_s16, [#allocation4], %s412_s25, %s412_s25, %s413_s26  }
  0x12   :  { %407 = dma.done.wait [#allocation4], 1024  }
  0x13   :  { %408 = vsyncadd [#allocation4], 4294966272  ;;  %v414_v0 = vmov 0   ;;  %v461_v1 = vld [vmem:[%s494_s0] sm:$0xff]  ;;  %v39_v3 = vld [vmem:[%s495_s1 + $0x8] sm:$0xff]  ;;  %v415_v4 = vmov 1   ;;  %v43_v15 = vlaneseq }
  0x14   :  { %348 = vset.pattern.permute.xlu1 %v414_v0  ;;  %347 = vset.pattern.permute.xlu0 %v414_v0  ;;  %v38_v2 = vld [vmem:[%s495_s1] sm:$0xff]  ;;  %v40_v5 = vld [vmem:[%s495_s1 + $0x10] sm:$0xff]  ;;  %v416_v6 = vmov 0.0   ;;  %v41_v7 = vld [vmem:[%s495_s1 + $0x18] sm:$0xff]  ;;  %vm417_vm0 = vmmov 0   ;;  %s418_s11 = smov 1  }
  0x15   :  { %46 = vperm.xlu1 %348, %v461_v1   ;;  %61 = vperm.xlu0 %347, %v38_v2   ;;  %v353_v8 = vld [vmem:[#allocation3] sm:$0xff]   ;;  %v354_v9 = vld [vmem:[#allocation3 + $0x8] sm:$0xff]   ;;  %v355_v10 = vld [vmem:[#allocation3 + $0x10] sm:$0xff]   ;;  %v44_v18 = vand.u32 127, %v43_v15  ;;  %v419_v21 = vmov 1.0|1.0  }
  0x16   :  { %309 = vmatprep.subr.bf16.mxu0 %v416_v6  ;;  %317 = vmatprep.subr.bf16.mxu1 %v416_v6  ;;  %v356_v11 = vld [vmem:[#allocation3 + $0x18] sm:$0xff]   ;;  %v357_v12 = vld [vmem:[#allocation3 + $0x20] sm:$0xff]   ;;  %v358_v13 = vld [vmem:[#allocation3 + $0x28] sm:$0xff]   ;;  %vm86_vm10 = vcmask 261120   ;;  %s420_s13 = smov [#allocation6]  }
  0x17   :  { %313 = vmatprep.mubr.msk.bf16.mxu0 %vm417_vm0, %v416_v6  ;;  %333 = vmatprep.mubr.msk.bf16.mxu1 %vm417_vm0, %v416_v6  ;;  %v359_v14 = vld [vmem:[#allocation3 + $0x30] sm:$0xff]   ;;  %v360_v26 = vld [vmem:[#allocation3 + $0x38] sm:$0xff]   ;;  %s269_s14 = sshll.u32 %s420_s13, 4  ;;  %s270_s14 = int_to_ptr.vmem [resolvable:$true] %s269_s14 }
  0x18   :  { %318 = vmatpush3.bf16.msra.mxu1 %v353_v8  ;;  %v296_v39 = vld [vmem:[%s497_s3] ss:$0 sm:$0xff]  ;;  %s385_s15 = scalar_lea.vmem %s270_s14, 128  ;;  %p390_p9 = scmp.lt.s32.totalorder %s270_s14, %s270_s14 }
  0x19   :  { %349 = vset.pattern.permute.xlu1 %v415_v4  ;;  %64 = vperm.xlu0 %347, %v39_v3   ;;  %p386_p8 = scmp.ne.s32.totalorder %s270_s14, %s385_s15  ;;  %p391_p10 = scmp.lt.s32.totalorder %s385_s15, %s385_s15 }
  0x1a   :  { %50 = vperm.xlu1 %349, %v461_v1   ;;  %319 = vmatprep.subr.bf16.mxu1 %v416_v6 }
  0x1b   :  { %p392_p11 = por %p391_p10, %p390_p9 }
  0x1c   :  { %320 = vmatpush3.bf16.msra.mxu1 %v354_v9 }
  0x1d   :  { %67 = vperm.xlu0 %347, %v40_v5   ;;  %321 = vmatprep.subr.bf16.mxu1 %v416_v6  ;;  %p393_p12 = pnand %p392_p11, %p386_p8 }
  0x1e   :  { %350 = vset.pattern.permute.xlu1 %v414_v0 }
  0x1f   :  { %70 = vperm.xlu1 %350, %v41_v7  }
  0x20   :  { %322 = vmatpush3.bf16.msra.mxu1 %v355_v10 }
  0x21   :  { %352 = vset.pattern.permute.xlu0 %v415_v4  ;;  %323 = vmatprep.subr.bf16.mxu1 %v416_v6 }
  0x22   :  { %241 = vrot.lane.b32.xlu0 %v461_v1, %s418_s11 }
  0x23   :  { %351 = vset.pattern.permute.xlu1 %v415_v4 }
  0x24   :  { %324 = vmatpush3.bf16.msra.mxu1 %v356_v11 }
  0x25   :  { %325 = vmatprep.subr.bf16.mxu1 %v416_v6 }
  0x28   :  { %326 = vmatpush3.bf16.msra.mxu1 %v357_v12 }
  0x29   :  { %327 = vmatprep.subr.bf16.mxu1 %v416_v6 }
  0x2c   :  { %328 = vmatpush3.bf16.msra.mxu1 %v358_v13 }
  0x2d   :  { %329 = vmatprep.subr.bf16.mxu1 %v416_v6 }
  0x30   :  { %330 = vmatpush3.bf16.msra.mxu1 %v359_v14 }
  0x31   :  { %331 = vmatprep.subr.bf16.mxu1 %v416_v6 }
  0x34   :  { %332 = vmatpush3.bf16.msra.mxu1 %v360_v26 }
  0x94   :  { %v47_v16 = vpop.permute.xlu1 %46  ;;  %v62_v17 = vpop.permute.xlu0 %61 }
  0x95   :  { %vm72_vm1 = vcmp.eq.s32.totalorder %v44_v18, %v62_v17  ;;  %vm48_vm5 = vcmp.ge.s32.totalorder %v44_v18, %v47_v16 }
  0x98   :  { %v65_v19 = vpop.permute.xlu0 %64 }
  0x99   :  { %vm73_vm2 = vcmp.eq.s32.totalorder %v44_v18, %v65_v19  ;;  %v51_v20 = vpop.permute.xlu1 %50 }
  0x9a   :  { %vm283_vm3 = vmpackc.low %vm73_vm2, %vm72_vm1  ;;  %vm52_vm4 = vcmp.lt.s32.totalorder %v44_v18, %v51_v20 }
  0x9b   :  { %310 = vmatpush3.bf16.msk.msra.mxu0 %vm283_vm3, %v419_v21  ;;  %vm53_vm6 = vmand %vm48_vm5, %vm52_vm4 }
  0x9c   :  { %v68_v22 = vpop.permute.xlu0 %67  ;;  %311 = vmatprep.subr.bf16.mxu0 %v416_v6  ;;  %v278_v24 = vsel %vm53_vm6, 1.0, %v416_v6 }
  0x9d   :  { %vm74_vm7 = vcmp.eq.s32.totalorder %v44_v18, %v68_v22  ;;  %v56_v25 = vpack.c.bf16 %v278_v24, %v278_v24 }
  0x9e   :  { %v71_v23 = vpop.permute.xlu1 %70 }
  0x9f   :  { %vm75_vm8 = vcmp.eq.s32.totalorder %v44_v18, %v71_v23 }
  0xa0   :  { %vm285_vm9 = vmpackc.low %vm75_vm8, %vm74_vm7  ;;  %v242_v27 = vpop.permute.xlu0 %241 }
  0xa1   :  { %312 = vmatpush3.bf16.msk.msra.mxu0 %vm285_vm9, %v419_v21  ;;  %v243_v28 = vsub.s32 %v461_v1, %v242_v27 }
  0xa3   :  { %v244_v29 = vcvt.s32.f32 %v243_v28 }
  0xa4   :  { %314 = vmatmul.mubr.msk.bf16.vlgmr.msra.gmra.mrb[0].mxu0 %vm86_vm10, %v56_v25 }
  0xa5   :  { %v245_v30 = vmax.f32 %v244_v29, 1.0 }
  0xa7   :  { %361 = vrcp.f32 %v245_v30 }
  0xb1   :  { %v362_v31 = vpop.eup %361 }
  0xb2   :  { %250 = vperm.xlu1 %351, %v362_v31  }
 0x131   :  { %v251_v37 = vpop.permute.xlu1 %250 }
 0x177   :  { %v124_v32 = vpop.f32.mrb[0].mxu0 }
 0x178   :  { %v131_v33 = vpack.c.bf16 %v124_v32, %v124_v32  ;;  %v315_v34 = vpop.f32.mrb[1].mxu0 }
 0x179   :  { %v127_v35 = vpop.f32.mrb[2].mxu0 }
 0x17a   :  { %v316_v36 = vpop.f32.mrb[3].mxu0  ;;  %334 = vmatmul.mubr.bf16.vlgmr.msra.gmra.mrb[0].mxu1 %v131_v33 }
 0x24d   :  { %v230_v38 = vpop.f32.mrb[0].mxu1 }
 0x24e   :  { %v253_v40 = vmul.f32 %v251_v37, %v230_v38  ;;  %v335_v41 = vpop.f32.mrb[1].mxu1 }
 0x24f   :  { %v233_v42 = vpop.f32.mrb[2].mxu1 }
 0x250   :  { %v261_v43 = vadd.f32 %v296_v39, %v253_v40  ;;  %v336_v44 = vpop.f32.mrb[3].mxu1 }
 0x252   :  { %262 = vst [vmem:[#allocation6] sm:$0xff] %v261_v43 }
 0x253   :  { %396 = shalt.err (!%p393_p12)
}
 0x254   :  { %s397_s3 = scalar_lea.hbm %s498_s4, 128 }
 0x255   :  { %p398_p13 = scmp.ne.s32.totalorder %s498_s4, %s397_s3  ;;  %p401_p0 = scmp.lt.u32.totalorder %s397_s3, %s498_s4 }
 0x257   :  { %p403_p1 = pnand %p401_p0, %p398_p13 }
 0x259   :  { %406 = shalt.err (!%p403_p1)
}
 0x25a   :  { %272 = dma.vmem_to_hbm [thread:$0]  %s270_s14, 128, %s498_s4, [#allocation5]  }
 0x25b   :  { %409 = dma.done.wait [#allocation5], 128  }
 0x25c   :  { %410 = vsyncadd [#allocation5], 4294967168 }
 0x25d   :  { %276 = vsyncpa [#allocation4], 1 }
 0x25e   :  { %277 = vsyncpa [#allocation5], 1 }

</bundles_post_ra>
